<compile_context>
chip_gen: v7x
topology: tpu7x:2x2x1
jax: 0.10.0
libtpu: 0.0.40
codegen_flags: <defaults>
</compile_context>

<pallas_src>
import math

import jax
import jax.numpy as jnp
from jax.experimental import pallas as pl
from jax.experimental.pallas import tpu as pltpu


def _round_up(x, m):
    return (x + m - 1) // m * m


def _biaffine_kernel(x2_ref, x1t_ref, w_ref, wrow_ref, c2_ref, o_ref, tmp_ref):
    # x2_ref  : (1, tM, Dp)  head tile (features only, zero padded), compute dtype
    # x1t_ref : (1, Dp, tN)  dep tile, PRE-TRANSPOSED -> plain NN matmul RHS (K, N)
    # w_ref   : (Dp, Dp)     zero-padded core weight W[:D,:D] (constant block)
    # wrow_ref: (1, Dp)      f32 head-bias row  b1 * W[D,:D]   (constant block)
    # c2_ref  : (1, tM, 1)   f32 per-head-row bias  b0*(x2 @ W[:D,D] + b1*W[D,D])
    # o_ref   : (1, tM, tN)  output tile out[j, i]  (head rows, dep cols)
    # tmp_ref : (tM, Dp)     f32 scratch: x2_tile @ W + wrow, cached across ni
    #
    # NOTE: the scratch caching relies on the L1-tile axis (grid axis 2) being
    # the innermost, sequential ("arbitrary") axis so ni == 0 runs before
    # ni > 0 for every (b, mi) - this also holds under v7x megacore sharding of
    # the outer "parallel" axes.  Do not reorder the grid.
    @pl.when(pl.program_id(2) == 0)
    def _():
        tmp_ref[...] = (
            jnp.dot(x2_ref[0], w_ref[...], preferred_element_type=jnp.float32)
            + wrow_ref[...])

    lhs = tmp_ref[...].astype(x1t_ref.dtype)      # single f32 -> bf16 rounding
    out = jnp.dot(lhs, x1t_ref[0], preferred_element_type=jnp.float32)
    o_ref[0] = (out + c2_ref[0]).astype(o_ref.dtype)


def biaffine_forward(input1, input2, weight, bias=(True, True), *,
                     tile_m=512, tile_n=256, compute_dtype=jnp.bfloat16,
                     out_dtype=None):
    """Biaffine scorer with out_features == 1.

    input1: dep  (B, L1, D)
    input2: head (B, L2, D)
    weight: (D + bias[1], D + bias[0]) == linear.weight of the PyTorch module
    Returns (B, L2, L1) scores (head index on axis 1, dep index on axis 2).

    tile_m / tile_n tile L2 / L1 (clamped to the problem size); defaults suit
    v5e/v6e/v7x.  out_dtype=jnp.bfloat16 halves output HBM traffic on v5e.
    """
    B, L1, D = input1.shape
    Bh, L2, Dh = input2.shape
    assert Bh == B and Dh == D
    d1 = D + int(bias[0])      # dep side  (columns of W)
    d2 = D + int(bias[1])      # head side (rows of W)
    assert weight.shape == (d2, d1)
    out_dtype = input1.dtype if out_dtype is None else out_dtype

    # Lane-aligned contraction dim: features only (bias via rank-1 corrections).
    Dp = _round_up(D, 128)

    # Clamp tiles to the real problem size (short parser sequences): tile_m a
    # multiple of 16 (bf16 sublane packing), tile_n a multiple of 128
    # (lane-dense unmasked output stores).
    tile_m = _round_up(max(16, min(tile_m, _round_up(L2, 16))), 16)
    tile_n = _round_up(max(128, min(tile_n, _round_up(L1, 128))), 128)
    # Keep both v7x TensorCores busy when batch == 1: split the L2 axis.
    if B == 1 and L2 > 16 and pl.cdiv(L2, tile_m) < 2:
        tile_m = _round_up(pl.cdiv(tile_m, 2), 16)
    L2p = _round_up(L2, tile_m)
    L1p = _round_up(L1, tile_n)

    cdt = compute_dtype
    f32 = jnp.float32

    # Padded operands (features only).  x1 is pre-transposed to (B, Dp, L1p) so
    # the in-kernel contraction is a plain NN matmul (no per-step transpose).
    x2p = jnp.zeros((B, L2p, Dp), cdt).at[:, :L2, :D].set(input2.astype(cdt))
    x1t = jnp.zeros((B, Dp, L1p), cdt).at[:, :D, :L1].set(
        jnp.swapaxes(input1, 1, 2).astype(cdt))
    wp = jnp.zeros((Dp, Dp), cdt).at[:D, :D].set(weight[:D, :D].astype(cdt))

    # Rank-1 bias corrections, kept in f32 for accuracy.
    wrow = jnp.zeros((1, Dp), f32)
    if bias[1]:
        wrow = wrow.at[0, :D].set(weight[D, :D].astype(f32))
    c2 = jnp.zeros((B, L2p, 1), f32)
    if bias[0]:
        r = jnp.einsum("bld,d->bl", input2.astype(f32), weight[:D, D].astype(f32))
        if bias[1]:
            r = r + weight[D, D].astype(f32)
        c2 = c2.at[:, :L2, 0].set(r)

    grid = (B, L2p // tile_m, L1p // tile_n)

    # VMEM budget: double-buffered blocks + f32 scratch, capped at device VMEM
    # minus headroom (64 MiB/TC on v7x, 128 MiB on v5e/v6e).
    isz = jnp.dtype(cdt).itemsize
    osz = jnp.dtype(out_dtype).itemsize
    per_step = (tile_m * Dp * isz + Dp * tile_n * isz + Dp * Dp * isz
                + Dp * 4 + tile_m * 4 + tile_m * tile_n * osz)
    vmem_needed = 2 * per_step + tile_m * Dp * 4
    try:
        vmem_cap = int(pltpu.get_tpu_info().vmem_capacity_bytes)
    except Exception:  # conservative fallback if the query is unavailable
        vmem_cap = 64 * 1024 * 1024
    vmem_limit = int(min(max(32 << 20, vmem_needed + (16 << 20)),
                         vmem_cap - (8 << 20)))

    cost = pl.CostEstimate(
        flops=2 * B * L2p * Dp * (Dp + L1p),
        transcendentals=0,
        bytes_accessed=(B * L2p * Dp * isz                      # x2, streamed once
                        + (L2p // tile_m) * B * Dp * L1p * isz  # x1, re-streamed
                        + Dp * Dp * isz + Dp * 4 + B * L2p * 4  # W, wrow, c2
                        + B * L2p * L1p * osz))                 # output

    out_padded = pl.pallas_call(
        _biaffine_kernel,
        out_shape=jax.ShapeDtypeStruct((B, L2p, L1p), out_dtype),
        grid_spec=pltpu.PrefetchScalarGridSpec(
            num_scalar_prefetch=0,
            grid=grid,
            in_specs=[
                # head tile: depends on (b, mi) only.
                pl.BlockSpec((1, tile_m, Dp), lambda b, mi, ni: (b, mi, 0)),
                # pre-transposed dep tile (K, N): depends on (b, ni) only.
                pl.BlockSpec((1, Dp, tile_n), lambda b, mi, ni: (b, 0, ni)),
                # weight: constant block index -> fetched once, never re-DMA'd.
                # TODO(synk): pipeline_mode=pl.Buffered(1) here reclaims
                # Dp*Dp*isz of VMEM on v7x on toolchains that accept
                # buffer_count=1; skipped to stay portable.
                pl.BlockSpec((Dp, Dp), lambda b, mi, ni: (0, 0)),
                pl.BlockSpec((1, Dp), lambda b, mi, ni: (0, 0)),
                pl.BlockSpec((1, tile_m, 1), lambda b, mi, ni: (b, mi, 0)),
            ],
            out_specs=pl.BlockSpec((1, tile_m, tile_n),
                                   lambda b, mi, ni: (b, mi, ni)),
            scratch_shapes=[pltpu.VMEM((tile_m, Dp), jnp.float32)],
        ),
        compiler_params=pltpu.CompilerParams(
            # batch / L2-tile axes are independent (megacore-shardable); the
            # inner L1-tile axis must stay sequential so the cached x2@W
            # scratch is valid.
            dimension_semantics=("parallel", "parallel", "arbitrary"),
            vmem_limit_bytes=vmem_limit,
        ),
        cost_estimate=cost,
    )(x2p, x1t, wp, wrow, c2)

    return out_padded[:, :L2, :L1]


def biaffine_reference(input1, input2, weight, bias):
    """Plain-JAX mirror of the PyTorch forward (out_features == 1)."""
    B, L1, _ = input1.shape
    _, L2, _ = input2.shape
    x1, x2 = input1, input2
    if bias[0]:
        x1 = jnp.concatenate([x1, jnp.ones((B, L1, 1), x1.dtype)], axis=-1)
    if bias[1]:
        x2 = jnp.concatenate([x2, jnp.ones((B, L2, 1), x2.dtype)], axis=-1)
    hp = jax.lax.Precision.HIGHEST
    affine = jnp.einsum("bik,ok->bio", x1, weight, precision=hp)   # (B, L1, D2)
    return jnp.einsum("bio,bjo->bji", affine, x2, precision=hp)    # (B, L2, L1)


def xavier_uniform(key, shape, dtype=jnp.float32):
    fan_out, fan_in = shape
    limit = math.sqrt(6.0 / (fan_in + fan_out))
    return jax.random.uniform(key, shape, dtype, minval=-limit, maxval=limit)


if __name__ == "__main__":
    key = jax.random.PRNGKey(0)
    k_w, k_x1, k_x2 = jax.random.split(key, 3)

    B, L1, L2, D = 2, 8, 6, 32          # batch, dep len, head len, hidden
    bias = (True, True)

    # Deterministic parameter init (nn.init.xavier_uniform_ on linear.weight).
    weight = xavier_uniform(k_w, (D + bias[1], D + bias[0]))
    input1 = jax.random.normal(k_x1, (B, L1, D), jnp.float32)   # dep
    input2 = jax.random.normal(k_x2, (B, L2, D), jnp.float32)   # head

    # Default fast path: bf16 MXU operands, f32 accumulation, f32 output.
    out = biaffine_forward(input1, input2, weight, bias=bias)
    out = jax.block_until_ready(out)
    assert out.shape == (B, L2, L1)

    ref = biaffine_reference(input1, input2, weight, bias)

    # Full-precision run of the same kernel for a tight structural check.
    out_f32 = biaffine_forward(input1, input2, weight, bias=bias,
                               compute_dtype=jnp.float32)
    out_f32 = jax.block_until_ready(out_f32)
    assert jnp.allclose(out_f32, ref, atol=1e-3, rtol=1e-3)
    # bf16 operands -> bf16-level tolerance against the f32 reference.
    assert jnp.allclose(out, ref, atol=1e-1, rtol=2e-2)

    # Extra structural checks: D an exact multiple of 128 (no feature padding,
    # exercises the rank-1 bias path end to end) and asymmetric bias flags.
    for idx, (Bx, L1x, L2x, Dx, bx) in enumerate(
            [(1, 20, 12, 128, (True, True)),
             (2, 9, 7, 32, (False, True)),
             (2, 9, 7, 32, (True, False))]):
        kw, k1, k2 = jax.random.split(jax.random.PRNGKey(idx + 1), 3)
        wx = xavier_uniform(kw, (Dx + bx[1], Dx + bx[0]))
        i1 = jax.random.normal(k1, (Bx, L1x, Dx), jnp.float32)
        i2 = jax.random.normal(k2, (Bx, L2x, Dx), jnp.float32)
        o = biaffine_forward(i1, i2, wx, bias=bx, compute_dtype=jnp.float32)
        o = jax.block_until_ready(o)
        r = biaffine_reference(i1, i2, wx, bx)
        assert o.shape == (Bx, L2x, L1x)
        assert jnp.allclose(o, r, atol=1e-3, rtol=1e-3)

    print("KERNEL_OK")
</pallas_src>

<mosaic_0001>
module attributes {stable_mosaic.version = 11 : i64} {
  func.func @_biaffine_kernel(%arg0: i32, %arg1: i32, %arg2: i32, %arg3: memref<1x16x128xbf16, #tpu.memory_space<vmem>>, %arg4: memref<1x128x128xbf16, #tpu.memory_space<vmem>>, %arg5: memref<128x128xbf16, #tpu.memory_space<vmem>>, %arg6: memref<1x128xf32, #tpu.memory_space<vmem>>, %arg7: memref<1x16x1xf32, #tpu.memory_space<vmem>>, %arg8: memref<1x16x128xf32, #tpu.memory_space<vmem>>, %arg9: memref<16x128xf32, #tpu.memory_space<vmem>>) attributes {dimension_semantics = [#tpu.dimension_semantics<parallel>, #tpu.dimension_semantics<parallel>, #tpu.dimension_semantics<arbitrary>], iteration_bounds = array<i64: 2, 1, 1>, scalar_prefetch = 0 : i64, scratch_operands = 1 : i64, tpu.core_type = #tpu.core_type<tc>, window_params = [{transform_indices = @transform_0, window_bounds = array<i64: 1, 16, 128>}, {transform_indices = @transform_1, window_bounds = array<i64: 1, 128, 128>}, {pipeline_mode = #tpu.pipeline_mode<synchronous>, transform_indices = @transform_2, window_bounds = array<i64: 128, 128>}, {pipeline_mode = #tpu.pipeline_mode<synchronous>, transform_indices = @transform_3, window_bounds = array<i64: 1, 128>}, {transform_indices = @transform_4, window_bounds = array<i64: 1, 16, 1>}, {transform_indices = @transform_5, window_bounds = array<i64: 1, 16, 128>}]} {
    %c0_i32 = arith.constant 0 : i32
    %0 = arith.cmpi eq, %arg2, %c0_i32 : i32
    %1 = arith.extui %0 : i1 to i32
    %c0_i32_0 = arith.constant 0 : i32
    %2 = arith.cmpi ne, %1, %c0_i32_0 : i32
    scf.if %2 {
      %c0_11 = arith.constant 0 : index
      %c0_12 = arith.constant 0 : index
      %c0_13 = arith.constant 0 : index
      %15 = vector.load %arg3[%c0_11, %c0_12, %c0_13] : memref<1x16x128xbf16, #tpu.memory_space<vmem>>, vector<1x16x128xbf16>
      %16 = vector.shape_cast %15 : vector<1x16x128xbf16> to vector<16x128xbf16>
      %c0_14 = arith.constant 0 : index
      %c0_15 = arith.constant 0 : index
      %17 = vector.load %arg5[%c0_14, %c0_15] : memref<128x128xbf16, #tpu.memory_space<vmem>>, vector<128x128xbf16>
      %cst_16 = arith.constant dense<0.000000e+00> : vector<16x128xf32>
      %18 = tpu.matmul %16, %17, %cst_16 {dimension_numbers = #tpu.dot_dimension_numbers<[1], [0], [0], [1], [0, 0, 1, 1], [], []>} : vector<16x128xbf16>, vector<128x128xbf16>, vector<16x128xf32> -> vector<16x128xf32>
      %c0_17 = arith.constant 0 : index
      %c0_18 = arith.constant 0 : index
      %19 = vector.load %arg6[%c0_17, %c0_18] : memref<1x128xf32, #tpu.memory_space<vmem>>, vector<1x128xf32>
      %20 = vector.broadcast %19 : vector<1x128xf32> to vector<16x128xf32>
      %21 = arith.addf %18, %20 : vector<16x128xf32>
      %c0_19 = arith.constant 0 : index
      %c0_20 = arith.constant 0 : index
      %22 = vector.load %arg9[%c0_19, %c0_20] : memref<16x128xf32, #tpu.memory_space<vmem>>, vector<16x128xf32>
      tpu.vector_store %arg9[%c0_19, %c0_20], %21 {strides = array<i32>} : memref<16x128xf32, #tpu.memory_space<vmem>>, vector<16x128xf32>,
    } else {
    }
    %c0 = arith.constant 0 : index
    %c0_1 = arith.constant 0 : index
    %3 = vector.load %arg9[%c0, %c0_1] : memref<16x128xf32, #tpu.memory_space<vmem>>, vector<16x128xf32>
    %4 = arith.truncf %3 : vector<16x128xf32> to vector<16x128xbf16>
    %c0_2 = arith.constant 0 : index
    %c0_3 = arith.constant 0 : index
    %c0_4 = arith.constant 0 : index
    %5 = vector.load %arg4[%c0_2, %c0_3, %c0_4] : memref<1x128x128xbf16, #tpu.memory_space<vmem>>, vector<1x128x128xbf16>
    %6 = vector.shape_cast %5 : vector<1x128x128xbf16> to vector<128x128xbf16>
    %cst = arith.constant dense<0.000000e+00> : vector<16x128xf32>
    %7 = tpu.matmul %4, %6, %cst {dimension_numbers = #tpu.dot_dimension_numbers<[1], [0], [0], [1], [0, 0, 1, 1], [], []>} : vector<16x128xbf16>, vector<128x128xbf16>, vector<16x128xf32> -> vector<16x128xf32>
    %c0_5 = arith.constant 0 : index
    %c0_6 = arith.constant 0 : index
    %c0_7 = arith.constant 0 : index
    %8 = vector.load %arg7[%c0_5, %c0_6, %c0_7] : memref<1x16x1xf32, #tpu.memory_space<vmem>>, vector<1x16x1xf32>
    %9 = vector.shape_cast %8 : vector<1x16x1xf32> to vector<16x1xf32>
    %10 = vector.broadcast %9 : vector<16x1xf32> to vector<16x128xf32>
    %11 = arith.addf %7, %10 : vector<16x128xf32>
    %c0_8 = arith.constant 0 : index
    %c0_9 = arith.constant 0 : index
    %c0_10 = arith.constant 0 : index
    %12 = vector.load %arg8[%c0_8, %c0_9, %c0_10] : memref<1x16x128xf32, #tpu.memory_space<vmem>>, vector<1x16x128xf32>
    %13 = vector.shape_cast %12 : vector<1x16x128xf32> to vector<16x128xf32>
    %14 = vector.shape_cast %11 : vector<16x128xf32> to vector<1x16x128xf32>
    tpu.vector_store %arg8[%c0_8, %c0_9, %c0_10], %14 {strides = array<i32>} : memref<1x16x128xf32, #tpu.memory_space<vmem>>, vector<1x16x128xf32>,
    return
  }
  func.func @transform_0(%arg0: i32, %arg1: i32, %arg2: i32) -> (i32, i32, i32) {
    %c0_i32 = arith.constant 0 : i32
    %c0_i32_0 = arith.constant 0 : i32
    return %arg0, %arg1, %c0_i32 : i32, i32, i32
  }
  func.func @transform_1(%arg0: i32, %arg1: i32, %arg2: i32) -> (i32, i32, i32) {
    %c0_i32 = arith.constant 0 : i32
    %c0_i32_0 = arith.constant 0 : i32
    return %arg0, %c0_i32, %arg2 : i32, i32, i32
  }
  func.func @transform_2(%arg0: i32, %arg1: i32, %arg2: i32) -> (i32, i32) {
    %c0_i32 = arith.constant 0 : i32
    %c0_i32_0 = arith.constant 0 : i32
    %c0_i32_1 = arith.constant 0 : i32
    return %c0_i32, %c0_i32_0 : i32, i32
  }
  func.func @transform_3(%arg0: i32, %arg1: i32, %arg2: i32) -> (i32, i32) {
    %c0_i32 = arith.constant 0 : i32
    %c0_i32_0 = arith.constant 0 : i32
    %c0_i32_1 = arith.constant 0 : i32
    return %c0_i32, %c0_i32_0 : i32, i32
  }
  func.func @transform_4(%arg0: i32, %arg1: i32, %arg2: i32) -> (i32, i32, i32) {
    %c0_i32 = arith.constant 0 : i32
    %c0_i32_0 = arith.constant 0 : i32
    return %arg0, %arg1, %c0_i32 : i32, i32, i32
  }
  func.func @transform_5(%arg0: i32, %arg1: i32, %arg2: i32) -> (i32, i32, i32) {
    %c0_i32 = arith.constant 0 : i32
    return %arg0, %arg1, %arg2 : i32, i32, i32
  }
}

</mosaic_0001>

<bundles_post_ra>
// kernel: tpu_custom_call.1
= control target key start
LH: loop header
LB: loop body
LE: loop exit
PB: predicated region body
PF: predicated region fallthrough
CT: control target
= control target key end

     0   :  { %10 = vsyncpa [#allocation4], 0  ;;  %s1398_s0 = inlined_call_operand.vmem [shape: bf16[2,16,128], index: 0, kind: input, shape index: {}]   ;;  %s1399_s1 = inlined_call_operand.hbm [shape: bf16[2,128,128], index: 1, kind: input, shape index: {}]   ;;  %s1400_s2 = inlined_call_operand.hbm [shape: bf16[128,128], index: 2, kind: input, shape index: {}]   ;;  %s1401_s3 = inlined_call_operand.vmem [shape: f32[1,128], index: 3, kind: input, shape index: {}]   ;;  %s1402_s4 = inlined_call_operand.vmem [shape: f32[2,16,1], index: 4, kind: input, shape index: {}]   ;;  %s1403_s5 = inlined_call_operand.hbm [shape: f32[2,16,128], index: 5, kind: output, shape index: {}]  }
   0x1   :  { %12 = vsyncpa [#allocation4 + $0x1], 0 }
   0x2   :  { %13 = vsyncpa [#allocation7], 0 }
   0x3   :  { %14 = vsyncpa [#allocation5], 0 }
   0x4   :  { %16 = vsyncpa [#allocation5 + $0x1], 0  ;;  %s1144_s18 = smov 0   ;;  %s1146_s19 = smov 0  }
   0x5   :  { %s1148_s20 = smov 0   ;;  %s1150_s21 = smov 0  }
   0x6   :  { %s1152_s22 = smov 0   ;;  %s1154_s23 = smov 0  }
   0x7 LB: > { %s759_s24 = sadd.s32 4294967295, %s1102_s23   ;;  %s760_s25 = sadd.s32 4294967294, %s1102_s23   ;;  %s1102_s23 = sphi %s1154_s23, %s22_s23   ;;  %s1098_s22 = sphi %s1152_s22, %s1429_s22   ;;  %s1094_s21 = sphi %s1150_s21, %s1428_s21   ;;  %s1090_s20 = sphi %s1148_s20, %s1427_s20   ;;  %s1086_s19 = sphi %s1146_s19, %s1426_s19   ;;  %s1082_s18 = sphi %s1144_s18, %s1425_s18  }
   0x8   : > { %p91_p0 = scmp.ne.s32.totalorder %s1086_s19, %s1082_s18  ;;  %p1178_p1 = scmp.eq.s32.totalorder %s759_s24, 0 }
   0x9   : > { %p1182_p2 = scmp.eq.s32.totalorder %s759_s24, 1  ;;  %p195_p3 = scmp.eq.s32.totalorder %s760_s25, 1 }
   0xa   : > { %s1409_s26 = scalar_select %p1178_p1, 1, 0 }
   0xb   : > { %s1410_s27 = scalar_select %p1182_p2, 1, 0 }
   0xc   : > { %p1188_p4 = por %p1178_p1, %p91_p0  ;;  %p761_p5 = scmp.ge.s32.totalorder %s1102_s23, 1 }
   0xd   : > { %p1193_p6 = por %p195_p3, %p91_p0  ;;  %p202_p7 = scmp.lt.s32.totalorder %s1102_s23, 3 }
   0xe   : > { %s1411_s28 = scalar_select %p1188_p4, 1, 0 }
   0xf   : > { %s1412_s29 = scalar_select %p1193_p6, 1, 0 }
  0x10   : > { %p1198_p8 = pnand %p761_p5, %p202_p7  ;;  %s1104_s6 = smov [#allocation6]  }
  0x11   : > { %s214_s7 = sshll.u32 %s1104_s6, 4  ;;  %s41_s9 = sadd.s32 1, %s1098_s22  ;;  %s215_s7 = int_to_ptr.vmem [resolvable:$true] %s214_s7 }
  0x12   : > { %s1413_s30 = scalar_select %p1198_p8, 1, 0 }
  0x13   : > { %p868_p9 = pneg %p1198_p8  ;;  %s958_s12 = scalar_lea.hbm %s1400_s2, 1024 }
  0x14   : > { %p959_p12 = scmp.ne.s32.totalorder %s1400_s2, %s958_s12  ;;  %p965_p5 = scmp.lt.u32.totalorder %s958_s12, %s1400_s2 }
  0x15   : > { %p1207_p11 = pnand %p868_p9, %p1178_p1 }
  0x17   : > { %p960_p13 = pneg %p1207_p11 }
  0x19   : > { %p961_p0 = pnand %p960_p13, %p959_p12 }
  0x1b   : > { %p962_p3 = pneg %p961_p0 }
  0x1d   : > { %p967_p7 = pnand %p965_p5, %p962_p3 }
  0x1f   : > { %970 = shalt.err (!%p967_p7)
}
  0x20   : > { %s971_s17 = scalar_lea.vmem %s215_s7, 1024  ;;  %p979_p1 = scmp.lt.s32.totalorder %s215_s7, %s215_s7 }
  0x21   : > { %p972_p9 = scmp.ne.s32.totalorder %s215_s7, %s971_s17  ;;  %p980_p4 = scmp.lt.s32.totalorder %s971_s17, %s971_s17 }
  0x23   : > { %p974_p10 = pnand %p972_p9, %p960_p13  ;;  %p981_p8 = por %p980_p4, %p979_p1 }
  0x25   : > { %p975_p6 = pneg %p974_p10 }
  0x27   : > { %p982_p2 = pnand %p981_p8, %p975_p6 }
  0x29   : > { %985 = shalt.err (!%p982_p2)
}
  0x2a   : > { %s1408_s24 = smov 64   ;;  %s1106_s25 = smov 4  }
  0x2b   : > { %871 = dma.hbm_to_vmem [thread:$0]  (!%p1207_p11), %s1400_s2, 1024, %s215_s7, [#allocation7], %s1408_s24, %s1408_s24, %s1106_s25  }
  0x2c   : > { %p43_p1 = scmp.ge.s32.totalorder %s41_s9, 2  ;;  %s78_s11 = sadd.s32 1, %s1090_s20 }
  0x2d   : > { %p85_p2 = scmp.ne.s32.totalorder %s1090_s20, %s1086_s19  ;;  %p86_p4 = scmp.eq.s32.totalorder %s1102_s23, 0 }
  0x2e   : > { %s1431_s9 = smov (%p43_p1, %s41_s9), 0  ;;  %p1416_p8 = scmp.ne.s32.totalorder %s1410_s27, 0 }
  0x2f   : > { %p1237_p6 = por %p86_p4, %p85_p2  ;;  %s73_s13 = ssub.s32 %s1098_s22, %s1431_s9 }
  0x30   : > { %p1243_p10 = por %p1416_p8, %p85_p2  ;;  %p881_p12 = scmp.lt.s32.totalorder %s1102_s23, 2 }
  0x31   : > { %p76_p11 = scmp.eq.s32.totalorder %s73_s13, 0  ;;  %s244_s7 = sand.u32 1, %s1090_s20  }
  0x32   : > { %s764_s14 = sshll.u32 %s244_s7, 6  ;;  %s798_s16 = sshll.u32 %s1098_s22, 10 }
  0x33   : > { %s1252_s15 = scalar_select %p76_p11, %s1090_s20, %s78_s11  }
  0x34   : > { %s1258_s10 = scalar_lea.hbm %s1399_s1, %s798_s16  ;;  %s248_s27 = scalar_lea.vmem [#allocation3], %s764_s14 }
  0x35   : > { %s256_s24 = sshll.u32 %s248_s27, 4  ;;  %p1264_p13 = pnand %p881_p12, %p1237_p6  ;;  %s1260_s24 = int_to_ptr.vmem [resolvable:$true] %s256_s24 }
  0x36   : > { %s1268_s11 = scalar_lea.sflag [#allocation4], %s244_s7  ;;  %s986_s17 = scalar_lea.hbm %s1258_s10, 1024 }
  0x37   : > { %p987_p0 = scmp.ne.s32.totalorder %s1258_s10, %s986_s17  ;;  %p988_p3 = pneg %p1264_p13 }
  0x38   : > { %s991_s12 = scalar_lea.hbm %s1399_s1, 2048  ;;  %p992_p9 = scmp.lt.u32.totalorder %s1258_s10, %s1399_s1 }
  0x39   : > { %p989_p5 = pnand %p988_p3, %p987_p0  ;;  %p993_p1 = scmp.lt.u32.totalorder %s991_s12, %s986_s17 }
  0x3a   : > { %p995_p4 = scmp.lt.u32.totalorder %s986_s17, %s1258_s10 }
  0x3b   : > { %p990_p7 = pneg %p989_p5  ;;  %p994_p2 = por %p993_p1, %p992_p9 }
  0x3d   : > { %p996_p6 = por %p995_p4, %p994_p2 }
  0x3f   : > { %p997_p8 = pnand %p996_p6, %p990_p7 }
  0x41   : > { %1000 = shalt.err (!%p997_p8)
}
  0x42   : > { %s1001_s7 = scalar_lea.vmem %s1260_s24, 1024  ;;  %s1107_s14 = smov [#allocation3]  }
  0x43   : > { %p1002_p12 = scmp.ne.s32.totalorder %s1260_s24, %s1001_s7  ;;  %s1006_s16 = sshll.u32 %s1107_s14, 4  ;;  %s1007_s16 = int_to_ptr.vmem [resolvable:$false] %s1006_s16 }
  0x44   : > { %s1008_s6 = scalar_lea.vmem %s1007_s16, 2048  ;;  %p1009_p5 = scmp.lt.s32.totalorder %s1260_s24, %s1007_s16 }
  0x45   : > { %p1004_p11 = pnand %p1002_p12, %p988_p3  ;;  %p1010_p9 = scmp.lt.s32.totalorder %s1008_s6, %s1001_s7 }
  0x47   : > { %p1005_p0 = pneg %p1004_p11  ;;  %p1011_p1 = por %p1010_p9, %p1009_p5 }
  0x49   : > { %p1012_p2 = pnand %p1011_p1, %p1005_p0 }
  0x4b   : > { %1015 = shalt.err (!%p1012_p2)
}
  0x4c   : > { %s1419_s17 = smov 64   ;;  %p1420_p3 = scmp.ne.s32.totalorder %s1413_s30, 0 }
  0x4d   : > { %875 = dma.hbm_to_vmem [thread:$0]  (!%p1264_p13), %s1258_s10, 1024, %s1260_s24, %s1268_s11, %s1419_s17, %s1419_s17, %s1106_s25  }
  0x4e   : > { %281 = sbr.rel (%p1420_p3) target bundleno = 572 (0x23c), region = 40  ;;  %s1302_s12 = sand.u32 (!%p1420_p3), 1, %s1086_s19  }
  0x4f   : > { %s768_s27 = sshll.u32 (!%p1420_p3), %s1302_s12, 6  ;;  %s284_s7 = scalar_lea.sflag (!%p1420_p3), [#allocation4], %s1302_s12 }
  0x50   : > { %s1306_s14 = scalar_lea.vmem (!%p1420_p3), [#allocation3], %s768_s27  ;;  %p1421_p7 = scmp.ne.s32.totalorder (!%p1420_p3), %s1411_s28, 0 }
  0x55   : > { %1069 = dma.done.wait (%p1421_p7), %s284_s7, 1024  }
  0x56   : > { %1071 = vsyncadd (%p1421_p7), %s284_s7, 4294966272  ;;  %p1422_p13 = scmp.ne.s32.totalorder %s1409_s26, 0 }
  0x58   : > { %1073 = dma.done.wait (%p1422_p13), [#allocation7], 1024  }
  0x59   : > { %1075 = vsyncadd (%p1422_p13), [#allocation7], 4294966272  ;;  %v1108_v0 = vmov 0.0   ;;  %vm1109_vm0 = vmmov 0   ;;  %p337_p4 = scmp.lt.s32.totalorder %s1094_s21, 1  ;;  %v941_v1 = vld [vmem:[#allocation6] sm:$0xff]  }
  0x5a   : > { %820 = vmatprep.subr.bf16.mxu0 %v1108_v0  ;;  %836 = vmatprep.mubr.msk.bf16.mxu0 %vm1109_vm0, %v1108_v0  ;;  %v942_v2 = vld [vmem:[#allocation6 + $0x8] sm:$0xff]   ;;  %v943_v3 = vld [vmem:[#allocation6 + $0x10] sm:$0xff]   ;;  %v950_v4 = vld [vmem:[%s1306_s14] sm:$0xff]   ;;  %v1110_v18 = vmov 0   ;;  %s770_s27 = sshll.u32 %s1302_s12, 4 }
  0x5b   : > { %840 = vmatprep.subr.bf16.mxu1 %v1108_v0  ;;  %856 = vmatprep.mubr.msk.bf16.mxu1 %vm1109_vm0, %v1108_v0  ;;  %s1318_s28 = scalar_select %p337_p4, %s1094_s21, 1  ;;  %v944_v5 = vld [vmem:[#allocation6 + $0x18] sm:$0xff]   ;;  %v951_v6 = vld [vmem:[%s1306_s14 + $0x8] sm:$0xff]   ;;  %v945_v7 = vld [vmem:[#allocation6 + $0x20] sm:$0xff]  }
  0x5c   : > { %821 = vmatpush3.bf16.msra.mxu0 %v941_v1  ;;  %841 = vmatpush3.bf16.msra.mxu1 %v950_v4  ;;  %v952_v8 = vld [vmem:[%s1306_s14 + $0x10] sm:$0xff]   ;;  %v946_v9 = vld [vmem:[#allocation6 + $0x28] sm:$0xff]   ;;  %v953_v10 = vld [vmem:[%s1306_s14 + $0x18] sm:$0xff]   ;;  %s335_s7 = scalar_lea.vmem [#allocation8], %s770_s27 }
  0x5d   : > { %822 = vmatprep.subr.bf16.mxu0 %v1108_v0  ;;  %s799_s26 = sshll.u32 %s1318_s28, 3  ;;  %842 = vmatprep.subr.bf16.mxu1 %v1108_v0  ;;  %v947_v11 = vld [vmem:[#allocation6 + $0x30] sm:$0xff]   ;;  %v954_v12 = vld [vmem:[%s1306_s14 + $0x20] sm:$0xff]   ;;  %v948_v13 = vld [vmem:[#allocation6 + $0x38] sm:$0xff]   ;;  %s800_s10 = sshll.u32 %s1318_s28, 4 }
  0x5e   : > { %s1324_s25 = scalar_lea.vmem %s1398_s0, %s799_s26  ;;  %v955_v14 = vld [vmem:[%s1306_s14 + $0x28] sm:$0xff]   ;;  %v956_v16 = vld [vmem:[%s1306_s14 + $0x30] sm:$0xff]   ;;  %v957_v17 = vld [vmem:[%s1306_s14 + $0x38] sm:$0xff]   ;;  %940 = vset.pattern.permute.xlu0 %v1110_v18  ;;  %s354_s16 = scalar_lea.vmem %s1402_s4, %s800_s10 }
  0x5f   : > { %v949_v15 = vld [vmem:[%s1324_s25] sm:$0xff]   ;;  %v504_v20 = vld [vmem:[%s354_s16 + $0x8] sm:$0xff]  ;;  %s623_s14 = sshll.u32 %s335_s7, 4  ;;  %s801_s28 = sshll.u32 %s1094_s21, 8  ;;  %s1344_s14 = int_to_ptr.vmem [resolvable:$true] %s623_s14 }
  0x60   : > { %823 = vmatpush3.bf16.msra.mxu0 %v942_v2  ;;  %843 = vmatpush3.bf16.msra.mxu1 %v951_v6  ;;  %v503_v19 = vld [vmem:[%s354_s16] sm:$0xff]  ;;  %s1349_s24 = scalar_lea.hbm %s1403_s5, %s801_s28  ;;  %s607_s21 = scalar_lea.sflag [#allocation5], %s1302_s12 }
  0x61   : > { %824 = vmatprep.subr.bf16.mxu0 %v1108_v0  ;;  %844 = vmatprep.subr.bf16.mxu1 %v1108_v0  ;;  %v775_v21 = vld [vmem:[%s1401_s3] ss:$0 sm:$0xff]  ;;  %s1016_s25 = scalar_lea.vmem %s1344_s14, 256  ;;  %s1111_s10 = smov [#allocation8]  }
  0x62   : > { %507 = vperm.xlu0 %940, %v503_v19   ;;  %p1017_p6 = scmp.ne.s32.totalorder %s1344_s14, %s1016_s25  ;;  %s1020_s13 = sshll.u32 %s1111_s10, 4  ;;  %s1021_s13 = int_to_ptr.vmem [resolvable:$false] %s1020_s13 }
  0x63   : > { %s1022_s11 = scalar_lea.vmem %s1021_s13, 512  ;;  %p1023_p11 = scmp.lt.s32.totalorder %s1344_s14, %s1021_s13 }
  0x64   : > { %825 = vmatpush3.bf16.msra.mxu0 %v943_v3  ;;  %845 = vmatpush3.bf16.msra.mxu1 %v952_v8  ;;  %p1018_p8 = pnand %p1017_p6, %p1243_p10  ;;  %p1024_p0 = scmp.lt.s32.totalorder %s1022_s11, %s1016_s25 }
  0x65   : > { %826 = vmatprep.subr.bf16.mxu0 %v1108_v0  ;;  %846 = vmatprep.subr.bf16.mxu1 %v1108_v0 }
  0x66   : > { %512 = vperm.xlu0 %940, %v504_v20   ;;  %p1019_p12 = pneg %p1018_p8  ;;  %p1025_p5 = por %p1024_p0, %p1023_p11 }
  0x68   : > { %827 = vmatpush3.bf16.msra.mxu0 %v944_v5  ;;  %847 = vmatpush3.bf16.msra.mxu1 %v953_v10  ;;  %p1026_p9 = pnand %p1025_p5, %p1019_p12 }
  0x69   : > { %828 = vmatprep.subr.bf16.mxu0 %v1108_v0  ;;  %848 = vmatprep.subr.bf16.mxu1 %v1108_v0 }
  0x6c   : > { %829 = vmatpush3.bf16.msra.mxu0 %v945_v7  ;;  %849 = vmatpush3.bf16.msra.mxu1 %v954_v12 }
  0x6d   : > { %830 = vmatprep.subr.bf16.mxu0 %v1108_v0  ;;  %850 = vmatprep.subr.bf16.mxu1 %v1108_v0 }
  0x70   : > { %831 = vmatpush3.bf16.msra.mxu0 %v946_v9  ;;  %851 = vmatpush3.bf16.msra.mxu1 %v955_v14 }
  0x71   : > { %832 = vmatprep.subr.bf16.mxu0 %v1108_v0  ;;  %852 = vmatprep.subr.bf16.mxu1 %v1108_v0 }
  0x74   : > { %833 = vmatpush3.bf16.msra.mxu0 %v947_v11  ;;  %853 = vmatpush3.bf16.msra.mxu1 %v956_v16 }
  0x75   : > { %834 = vmatprep.subr.bf16.mxu0 %v1108_v0  ;;  %854 = vmatprep.subr.bf16.mxu1 %v1108_v0 }
  0x78   : > { %835 = vmatpush3.bf16.msra.mxu0 %v948_v13  ;;  %855 = vmatpush3.bf16.msra.mxu1 %v957_v17 }
  0x7b   : > { %837 = vmatmul.mubr.bf16.vlgmr.msra.gmra.mrb[0].mxu0 %v949_v15 }
  0xe1   : > { %v508_v29 = vpop.permute.xlu0 %507 }
  0xe5   : > { %v513_v33 = vpop.permute.xlu0 %512 }
 0x14e   : > { %v475_v22 = vpop.f32.mrb[0].mxu0 }
 0x14f   : > { %v838_v23 = vpop.f32.mrb[1].mxu0  ;;  %v476_v25 = vadd.f32 %v775_v21, %v475_v22 }
 0x150   : > { %v478_v24 = vpop.f32.mrb[2].mxu0 }
 0x151   : > { %v479_v26 = vadd.f32 %v775_v21, %v478_v24  ;;  %v839_v27 = vpop.f32.mrb[3].mxu0 }
 0x153   : > { %v486_v28 = vpack.c.bf16 %v479_v26, %v476_v25 }
 0x155   : > { %857 = vmatmul.mubr.bf16.vlgmr.msra.gmra.mrb[0].mxu1 %v486_v28 }
 0x228   : > { %v597_v30 = vpop.f32.mrb[0].mxu1 }
 0x229   : > { %v598_v31 = vadd.f32 %v597_v30, %v508_v29  ;;  %v858_v32 = vpop.f32.mrb[1].mxu1 }
 0x22a   : > { %v600_v34 = vpop.f32.mrb[2].mxu1 }
 0x22b   : > { %604 = vst [vmem:[%s335_s7] sm:$0xff] %v598_v31  ;;  %v601_v35 = vadd.f32 %v600_v34, %v513_v33  ;;  %v859_v36 = vpop.f32.mrb[3].mxu1 }
 0x22d   : > { %605 = vst [vmem:[%s335_s7 + $0x8] sm:$0xff] %v601_v35 }
 0x22e   : > { %1029 = shalt.err (!%p1026_p9)
}
 0x22f   : > { %s1030_s16 = scalar_lea.hbm %s1349_s24, 256  ;;  %s1034_s27 = scalar_lea.hbm %s1403_s5, 512 }
 0x230   : > { %p1031_p1 = scmp.ne.s32.totalorder %s1349_s24, %s1030_s16  ;;  %p1035_p7 = scmp.lt.u32.totalorder %s1349_s24, %s1403_s5 }
 0x231   : > { %p1036_p13 = scmp.lt.u32.totalorder %s1034_s27, %s1030_s16  ;;  %p1038_p6 = scmp.lt.u32.totalorder %s1030_s16, %s1349_s24 }
 0x232   : > { %p1032_p2 = pnand %p1031_p1, %p1243_p10 }
 0x233   : > { %p1037_p4 = por %p1036_p13, %p1035_p7 }
 0x234   : > { %p1033_p3 = pneg %p1032_p2 }
 0x235   : > { %p1039_p8 = por %p1038_p6, %p1037_p4 }
 0x237   : > { %p1040_p12 = pnand %p1039_p8, %p1033_p3 }
 0x239   : > { %1043 = shalt.err (!%p1040_p12)
}
 0x23a   : > { %s1112_s26 = smov 128   ;;  %s1113_s30 = smov 8  }
 0x23b   : > { %866 = dma.vmem_to_hbm [thread:$0]  (%p1243_p10), %s1344_s14, 256, %s1349_s24, %s607_s21, %s1112_s26, %s1112_s26, %s1113_s30  }
 0x23c PF: > { %s638_s25 = sand.u32 1, %s1082_s18   ;;  %p1423_p11 = scmp.ne.s32.totalorder %s1412_s29, 0 }
 0x23d   : > { %p1424_p0 = scmp.ge.s32.totalorder %s1102_s23, 2  ;;  %s639_s10 = scalar_lea.sflag [#allocation5], %s638_s25 }
 0x23f   : > { %p877_p5 = pnand %p1424_p0, %p1423_p11 }
 0x241   : > { %1077 = dma.done.wait (!%p877_p5), %s639_s10, 256  }
 0x242   : > { %1079 = vsyncadd (!%p877_p5), %s639_s10, 4294967040  ;;  %s22_s23 = sadd.s32 1, %s1102_s23   ;;  %s1425_s18 = smov %s1086_s19 }
 0x243   : > { %p19_p9 = scmp.ge.s32.totalorder %s22_s23, 4   ;;  %s1426_s19 = smov %s1090_s20 }
 0x244   : > { %s1427_s20 = smov %s1252_s15  ;;  %s1428_s21 = smov %s1098_s22 }
 0x245   : > { %s1429_s22 = smov %s1431_s9  ;;  %21 = sbr.rel (!%p19_p9) target bundleno = 7 (0x7), region = 99 }
 0x24c   :  { %644 = vsyncpa [#allocation4], 1 }
 0x24d   :  { %646 = vsyncpa [#allocation4 + $0x1], 1 }
 0x24e   :  { %647 = vsyncpa [#allocation7], 1 }
 0x24f   :  { %648 = vsyncpa [#allocation5], 1 }
 0x250   :  { %650 = vsyncpa [#allocation5 + $0x1], 1 }

</bundles_post_ra>
